<compile_context>
chip_gen: v5e
topology: v5e:2x2
jax: 0.10.0
libtpu: 0.0.40
codegen_flags: <defaults>
</compile_context>

<pallas_src>
import jax
import jax.numpy as jnp
from jax.experimental import pallas as pl
from jax.experimental.pallas import tpu as pltpu


_LANE = 128        # last-dim tiling unit (vreg lane width)
_SUBLANE = 8       # second-to-last-dim tiling unit (vreg sublanes)
# Cap on scoped VMEM: below physical on every generation (v5e/v6e 128 MiB,
# v7x 64 MiB) while leaving headroom; default tiles use only a few MiB.
_VMEM_LIMIT = 48 * 1024 * 1024


def _round_up(n, m):
    return ((n + m - 1) // m) * m


def _pick_tile(n, candidates):
    """Largest candidate tile that divides n (n is pre-padded so one always does)."""
    for c in candidates:
        if n % c == 0:
            return c
    return n


def _pick_k_tile(d):
    """K (reduction) tile for the single-linear path."""
    if d <= 1024:
        return d                      # full-K block (always a legal block dim)
    for c in (1024, 512, 256, 128):
        if d % c == 0:
            return c
    return d                          # odd large D: fall back to full K


# ---------------------------------------------------------------------------
# Kernels
# ---------------------------------------------------------------------------
def _fc_expand_kernel(x_ref, w1_ref, b1_ref, w2_ref, b2_ref, o_ref):
    """One (TM, TN) output tile of relu(x @ W1t + b1) @ W2t + b2.

    x_ref : (TM, D)        w1_ref: (D, E_pad)   b1_ref: (1, E_pad)  [f32]
    w2_ref: (E_pad, TN)    b2_ref: (1, TN)      [f32]
    Hidden (TM, E_pad) lives only in VMEM/vregs — never written to HBM.
    """
    h = jnp.dot(x_ref[...], w1_ref[...], preferred_element_type=jnp.float32)
    h = jnp.maximum(h + b1_ref[...], 0.0)
    # Explicit precision choice: feed the second MXU matmul operands in the
    # weight dtype (bf16 on v6e/v7x if compute_dtype=bf16), accumulate in f32.
    y = jnp.dot(h.astype(w2_ref.dtype), w2_ref[...],
                preferred_element_type=jnp.float32)
    o_ref[...] = (y + b2_ref[...]).astype(o_ref.dtype)


def _fc_single_kernel(x_ref, w_ref, b_ref, o_ref, acc_ref):
    """K-tiled single linear: acc += x_k @ W_k; finalize with bias at last k.

    x_ref: (TM, TK)   w_ref: (TK, TN)   b_ref: (1, TN) [f32]
    acc_ref: (TM, TN) f32 scratch, persistent across the k ("arbitrary") axis.
    """
    k = pl.program_id(2)

    @pl.when(k == 0)
    def _():
        acc_ref[...] = jnp.zeros_like(acc_ref)

    acc_ref[...] += jnp.dot(x_ref[...], w_ref[...],
                            preferred_element_type=jnp.float32)

    @pl.when(k == pl.num_programs(2) - 1)
    def _():
        o_ref[...] = (acc_ref[...] + b_ref[...]).astype(o_ref.dtype)


# ---------------------------------------------------------------------------
# One-time parameter preparation (transpose + lane padding, paid once)
# ---------------------------------------------------------------------------
def prepare_fc_params(params, expand_dim, compute_dtype=None):
    """Transpose nn.Linear weights to (in, out), zero-pad feature dims to
    multiples of 128 (lane-dense MXU/store tiles), reshape biases to (1, out).
    Zero padding keeps outputs exact; padded columns are sliced off after the
    kernel. Call once per parameter set, not per forward."""
    def cast(a):
        return a.astype(compute_dtype) if compute_dtype is not None else a

    if expand_dim > 0:
        w1, b1, w2, b2 = params["w1"], params["b1"], params["w2"], params["b2"]
        E, D = w1.shape
        O = w2.shape[0]
        E_pad = _round_up(E, _LANE)
        O_pad = _round_up(O, _LANE)
        w1t = jnp.pad(jnp.transpose(w1), ((0, 0), (0, E_pad - E)))        # (D, E_pad)
        b1p = jnp.pad(b1, (0, E_pad - E)).reshape(1, E_pad)               # (1, E_pad)
        w2t = jnp.pad(jnp.transpose(w2), ((0, E_pad - E), (0, O_pad - O)))  # (E_pad, O_pad)
        b2p = jnp.pad(b2, (0, O_pad - O)).reshape(1, O_pad)               # (1, O_pad)
        return {
            "w1t": cast(w1t), "b1": b1p.astype(jnp.float32),
            "w2t": cast(w2t), "b2": b2p.astype(jnp.float32),
            "out_dim": O,
        }
    else:
        w, b = params["w"], params["b"]
        O, D = w.shape
        O_pad = _round_up(O, _LANE)
        wt = jnp.pad(jnp.transpose(w), ((0, 0), (0, O_pad - O)))          # (D, O_pad)
        bp = jnp.pad(b, (0, O_pad - O)).reshape(1, O_pad)                 # (1, O_pad)
        return {"wt": cast(wt), "b": bp.astype(jnp.float32), "out_dim": O}


# ---------------------------------------------------------------------------
# Forward
# ---------------------------------------------------------------------------
def fc_forward(x, prepared, expand_dim, compute_dtype=None):
    """Pallas implementation of FC.forward. `prepared` comes from
    prepare_fc_params. Returns (batch, output_dim) in x.dtype."""
    out_dtype = x.dtype
    B, D = x.shape
    O = prepared["out_dim"]

    # Batch padding to a sublane multiple (cheap, per-call, usually a no-op).
    B_pad = _round_up(B, _SUBLANE)
    TM = _pick_tile(B_pad, (256, 128, 64, 32, 16, 8))
    xp = x.astype(compute_dtype) if compute_dtype is not None else x
    if B_pad != B:
        xp = jnp.pad(xp, ((0, B_pad - B), (0, 0)))

    if expand_dim > 0:
        w1t, b1 = prepared["w1t"], prepared["b1"]
        w2t, b2 = prepared["w2t"], prepared["b2"]
        E_pad = w1t.shape[1]
        O_pad = w2t.shape[1]
        TN = _pick_tile(O_pad, (256, 128))

        # Grid: (output tiles, batch tiles). Batch is the fastest-varying axis
        # and the weight index_maps ignore it -> weight tiles stay resident.
        out = pl.pallas_call(
            _fc_expand_kernel,
            out_shape=jax.ShapeDtypeStruct((B_pad, O_pad), out_dtype),
            grid_spec=pltpu.PrefetchScalarGridSpec(
                num_scalar_prefetch=0,
                grid=(O_pad // TN, B_pad // TM),
                in_specs=[
                    pl.BlockSpec((TM, D),      lambda j, i: (i, 0)),  # x
                    pl.BlockSpec((D, E_pad),   lambda j, i: (0, 0)),  # W1t (resident)
                    pl.BlockSpec((1, E_pad),   lambda j, i: (0, 0)),  # b1  (resident)
                    pl.BlockSpec((E_pad, TN),  lambda j, i: (0, j)),  # W2t (per out tile)
                    pl.BlockSpec((1, TN),      lambda j, i: (0, j)),  # b2
                ],
                out_specs=pl.BlockSpec((TM, TN), lambda j, i: (i, j)),
            ),
            compiler_params=pltpu.CompilerParams(
                dimension_semantics=("parallel", "parallel"),
                vmem_limit_bytes=_VMEM_LIMIT),
        )(xp, w1t, b1, w2t, b2)
        return out[:B, :O]

    else:
        wt, b = prepared["wt"], prepared["b"]
        O_pad = wt.shape[1]
        TN = _pick_tile(O_pad, (256, 128))
        TK = _pick_k_tile(D)
        nk = D // TK if D % TK == 0 else 1

        out = pl.pallas_call(
            _fc_single_kernel,
            out_shape=jax.ShapeDtypeStruct((B_pad, O_pad), out_dtype),
            grid_spec=pltpu.PrefetchScalarGridSpec(
                num_scalar_prefetch=0,
                grid=(O_pad // TN, B_pad // TM, nk),
                in_specs=[
                    pl.BlockSpec((TM, TK), lambda j, i, k: (i, k)),   # x
                    pl.BlockSpec((TK, TN), lambda j, i, k: (k, j)),   # Wt
                    pl.BlockSpec((1, TN),  lambda j, i, k: (0, j)),   # b
                ],
                out_specs=pl.BlockSpec((TM, TN), lambda j, i, k: (i, j)),
                scratch_shapes=[pltpu.VMEM((TM, TN), jnp.float32)],
            ),
            compiler_params=pltpu.CompilerParams(
                dimension_semantics=("parallel", "parallel", "arbitrary"),
                vmem_limit_bytes=_VMEM_LIMIT),
        )(xp, wt, b)
        return out[:B, :O]


# ---------------------------------------------------------------------------
# Reference (plain JAX) for correctness check
# ---------------------------------------------------------------------------
def fc_forward_ref(x, params, expand_dim):
    if expand_dim > 0:
        h = x @ params["w1"].T + params["b1"]
        h = jnp.maximum(h, 0.0)
        return h @ params["w2"].T + params["b2"]
    return x @ params["w"].T + params["b"]


# ---------------------------------------------------------------------------
# Main
# ---------------------------------------------------------------------------
if __name__ == "__main__":
    key = jax.random.PRNGKey(0)
    k_x, k_w1, k_b1, k_w2, k_b2, k_w, k_b = jax.random.split(key, 7)

    batch, input_dim, expand_dim, output_dim = 8, 32, 64, 16
    stddev = 0.02  # module's stddev attribute (init-time only)

    x = jax.random.normal(k_x, (batch, input_dim), dtype=jnp.float32)

    # Case 1: expand_dim > 0 (fc_new -> relu -> fc), fused in one kernel.
    params_expand = {
        "w1": stddev * jax.random.normal(k_w1, (expand_dim, input_dim), jnp.float32),
        "b1": stddev * jax.random.normal(k_b1, (expand_dim,), jnp.float32),
        "w2": stddev * jax.random.normal(k_w2, (output_dim, expand_dim), jnp.float32),
        "b2": stddev * jax.random.normal(k_b2, (output_dim,), jnp.float32),
    }
    prep_expand = prepare_fc_params(params_expand, expand_dim)   # once, not per call
    out_expand = jax.block_until_ready(fc_forward(x, prep_expand, expand_dim))
    ref_expand = fc_forward_ref(x, params_expand, expand_dim)
    assert out_expand.shape == (batch, output_dim)
    assert jnp.allclose(out_expand, ref_expand, atol=1e-5, rtol=1e-5)

    # Case 2: expand_dim == 0 (single linear), K-tiled with f32 accumulator.
    params_single = {
        "w": stddev * jax.random.normal(k_w, (output_dim, input_dim), jnp.float32),
        "b": stddev * jax.random.normal(k_b, (output_dim,), jnp.float32),
    }
    prep_single = prepare_fc_params(params_single, 0)
    out_single = jax.block_until_ready(fc_forward(x, prep_single, 0))
    ref_single = fc_forward_ref(x, params_single, 0)
    assert out_single.shape == (batch, output_dim)
    assert jnp.allclose(out_single, ref_single, atol=1e-5, rtol=1e-5)

    print("KERNEL_OK")
</pallas_src>

<mosaic_0001>
module attributes {stable_mosaic.version = 11 : i64} {
  func.func @_fc_expand_kernel(%arg0: i32, %arg1: i32, %arg2: memref<8x32xf32, #tpu.memory_space<vmem>>, %arg3: memref<32x128xf32, #tpu.memory_space<vmem>>, %arg4: memref<1x128xf32, #tpu.memory_space<vmem>>, %arg5: memref<128x128xf32, #tpu.memory_space<vmem>>, %arg6: memref<1x128xf32, #tpu.memory_space<vmem>>, %arg7: memref<8x128xf32, #tpu.memory_space<vmem>>) attributes {dimension_semantics = [#tpu.dimension_semantics<parallel>, #tpu.dimension_semantics<parallel>], iteration_bounds = array<i64: 1, 1>, scalar_prefetch = 0 : i64, scratch_operands = 0 : i64, tpu.core_type = #tpu.core_type<tc>, window_params = [{transform_indices = @transform_0, window_bounds = array<i64: 8, 32>}, {pipeline_mode = #tpu.pipeline_mode<synchronous>, transform_indices = @transform_1, window_bounds = array<i64: 32, 128>}, {pipeline_mode = #tpu.pipeline_mode<synchronous>, transform_indices = @transform_2, window_bounds = array<i64: 1, 128>}, {transform_indices = @transform_3, window_bounds = array<i64: 128, 128>}, {transform_indices = @transform_4, window_bounds = array<i64: 1, 128>}, {transform_indices = @transform_5, window_bounds = array<i64: 8, 128>}]} {
    %c0 = arith.constant 0 : index
    %c0_0 = arith.constant 0 : index
    %0 = vector.load %arg2[%c0, %c0_0] : memref<8x32xf32, #tpu.memory_space<vmem>>, vector<8x32xf32>
    %c0_1 = arith.constant 0 : index
    %c0_2 = arith.constant 0 : index
    %1 = vector.load %arg3[%c0_1, %c0_2] : memref<32x128xf32, #tpu.memory_space<vmem>>, vector<32x128xf32>
    %cst = arith.constant dense<0.000000e+00> : vector<8x128xf32>
    %2 = tpu.matmul %0, %1, %cst {dimension_numbers = #tpu.dot_dimension_numbers<[1], [0], [0], [1], [0, 0, 1, 1], [], []>} : vector<8x32xf32>, vector<32x128xf32>, vector<8x128xf32> -> vector<8x128xf32>
    %c0_3 = arith.constant 0 : index
    %c0_4 = arith.constant 0 : index
    %3 = vector.load %arg4[%c0_3, %c0_4] : memref<1x128xf32, #tpu.memory_space<vmem>>, vector<1x128xf32>
    %4 = vector.broadcast %3 : vector<1x128xf32> to vector<8x128xf32>
    %5 = arith.addf %2, %4 : vector<8x128xf32>
    %cst_5 = arith.constant 0.000000e+00 : f32
    %6 = vector.broadcast %cst_5 : f32 to vector<8x128xf32>
    %7 = arith.maximumf %5, %6 : vector<8x128xf32>
    %c0_6 = arith.constant 0 : index
    %c0_7 = arith.constant 0 : index
    %8 = vector.load %arg5[%c0_6, %c0_7] : memref<128x128xf32, #tpu.memory_space<vmem>>, vector<128x128xf32>
    %cst_8 = arith.constant dense<0.000000e+00> : vector<8x128xf32>
    %9 = tpu.matmul %7, %8, %cst_8 {dimension_numbers = #tpu.dot_dimension_numbers<[1], [0], [0], [1], [0, 0, 1, 1], [], []>} : vector<8x128xf32>, vector<128x128xf32>, vector<8x128xf32> -> vector<8x128xf32>
    %c0_9 = arith.constant 0 : index
    %c0_10 = arith.constant 0 : index
    %10 = vector.load %arg6[%c0_9, %c0_10] : memref<1x128xf32, #tpu.memory_space<vmem>>, vector<1x128xf32>
    %11 = vector.broadcast %10 : vector<1x128xf32> to vector<8x128xf32>
    %12 = arith.addf %9, %11 : vector<8x128xf32>
    %c0_11 = arith.constant 0 : index
    %c0_12 = arith.constant 0 : index
    %13 = vector.load %arg7[%c0_11, %c0_12] : memref<8x128xf32, #tpu.memory_space<vmem>>, vector<8x128xf32>
    tpu.vector_store %arg7[%c0_11, %c0_12], %12 {strides = array<i32>} : memref<8x128xf32, #tpu.memory_space<vmem>>, vector<8x128xf32>,
    return
  }
  func.func @transform_0(%arg0: i32, %arg1: i32) -> (i32, i32) {
    %c0_i32 = arith.constant 0 : i32
    %c0_i32_0 = arith.constant 0 : i32
    return %arg1, %c0_i32 : i32, i32
  }
  func.func @transform_1(%arg0: i32, %arg1: i32) -> (i32, i32) {
    %c0_i32 = arith.constant 0 : i32
    %c0_i32_0 = arith.constant 0 : i32
    %c0_i32_1 = arith.constant 0 : i32
    return %c0_i32, %c0_i32_0 : i32, i32
  }
  func.func @transform_2(%arg0: i32, %arg1: i32) -> (i32, i32) {
    %c0_i32 = arith.constant 0 : i32
    %c0_i32_0 = arith.constant 0 : i32
    %c0_i32_1 = arith.constant 0 : i32
    return %c0_i32, %c0_i32_0 : i32, i32
  }
  func.func @transform_3(%arg0: i32, %arg1: i32) -> (i32, i32) {
    %c0_i32 = arith.constant 0 : i32
    %c0_i32_0 = arith.constant 0 : i32
    return %c0_i32, %arg0 : i32, i32
  }
  func.func @transform_4(%arg0: i32, %arg1: i32) -> (i32, i32) {
    %c0_i32 = arith.constant 0 : i32
    %c0_i32_0 = arith.constant 0 : i32
    return %c0_i32, %arg0 : i32, i32
  }
  func.func @transform_5(%arg0: i32, %arg1: i32) -> (i32, i32) {
    %c0_i32 = arith.constant 0 : i32
    return %arg1, %arg0 : i32, i32
  }
}

</mosaic_0001>

<bundles_post_ra>
// kernel: tpu_custom_call.1
= control target key start
LH: loop header
LB: loop body
LE: loop exit
PB: predicated region body
PF: predicated region fallthrough
CT: control target
= control target key end

     0   :  { %10 = vsyncpa [#allocation3], 0  ;;  %s324_s0 = inlined_call_operand.hbm [shape: f32[8,32], index: 0, kind: input, shape index: {}]   ;;  %s325_s1 = inlined_call_operand.hbm [shape: f32[32,128], index: 1, kind: input, shape index: {}]   ;;  %s326_s2 = inlined_call_operand.vmem [shape: f32[1,128], index: 2, kind: input, shape index: {}]   ;;  %s327_s3 = inlined_call_operand.hbm [shape: f32[128,128], index: 3, kind: input, shape index: {}]   ;;  %s328_s4 = inlined_call_operand.vmem [shape: f32[1,128], index: 4, kind: input, shape index: {}]   ;;  %s329_s5 = inlined_call_operand.hbm [shape: f32[8,128], index: 5, kind: output, shape index: {}]  }
   0x1   :  { %11 = vsyncpa [#allocation6], 0  ;;  %s28_s20 = sshll.u32 %s325_s1, 4  ;;  %s29_s20 = int_to_ptr.hbm [resolvable:$true] %s28_s20 }
   0x2   :  { %12 = vsyncpa [#allocation4], 0  ;;  %s270_s21 = smov [#allocation5]   ;;  %s18_s25 = sshll.u32 %s324_s0, 4  ;;  %s19_s25 = int_to_ptr.hbm [resolvable:$true] %s18_s25 }
   0x3   :  { %s30_s22 = sshll.u32 %s270_s21, 4  ;;  %s271_s26 = smov 128   ;;  %s31_s22 = int_to_ptr.vmem [resolvable:$true] %s30_s22 }
   0x4   :  { %s272_s27 = smov 8   ;;  %s273_s28 = smov [#allocation2]  }
   0x5   :  { %36 = dma.hbm_to_vmem [thread:$0]  %s29_s20, 512, %s31_s22, [#allocation6], %s271_s26, %s271_s26, %s272_s27  }
   0x6   :  { %s20_s29 = sshll.u32 %s273_s28, 4  ;;  %s43_s7 = sshll.u32 %s327_s3, 4  ;;  %s21_s29 = int_to_ptr.vmem [resolvable:$true] %s20_s29  ;;  %s44_s7 = int_to_ptr.hbm [resolvable:$true] %s43_s7 }
   0x7   :  { %23 = dma.hbm_to_vmem [thread:$0]  %s19_s25, 128, %s21_s29, [#allocation3]  }
   0x8   :  { %s274_s1 = smov [#allocation7]  }
   0x9   :  { %s45_s8 = sshll.u32 %s274_s1, 4  ;;  %s46_s8 = int_to_ptr.vmem [resolvable:$true] %s45_s8 }
   0xa   :  { %51 = dma.hbm_to_vmem [thread:$0]  %s44_s7, 2048, %s46_s8, [#allocation6], %s271_s26, %s271_s26, %s272_s27  }
   0xb   :  { %264 = dma.done.wait [#allocation3], 128  }
   0xc   :  { %265 = vsyncadd [#allocation3], 4294967168 }
   0xd   :  { %266 = dma.done.wait [#allocation6], 2560  }
   0xe   :  { %267 = vsyncadd [#allocation6], 4294964736  ;;  %v70_v0 = vld [vmem:[#allocation5 + $0x18] sm:$0xff]  ;;  %v69_v1 = vld [vmem:[#allocation5 + $0x10] sm:$0xff]  ;;  %vm75_vm0 = vcmask 261120   ;;  %s275_s11 = smov [#allocation8]  }
   0xf   :  { %91 = vmatpush.msra.mxu0 %v70_v0  ;;  %v115_v2 = vld [vmem:[#allocation7 + $0x78] sm:$0xff]  ;;  %v68_v3 = vld [vmem:[#allocation5 + $0x8] sm:$0xff]  ;;  %v114_v4 = vld [vmem:[#allocation7 + $0x70] sm:$0xff]  ;;  %s146_s12 = sshll.u32 %s275_s11, 4  ;;  %s148_s15 = sshll.u32 %s329_s5, 4  ;;  %s147_s12 = int_to_ptr.vmem [resolvable:$true] %s146_s12  ;;  %s149_s15 = int_to_ptr.hbm [resolvable:$true] %s148_s15 }
  0x10   :  { %120 = vmatpush.msra.mxu1 %v115_v2  ;;  %v113_v5 = vld [vmem:[#allocation7 + $0x68] sm:$0xff]  ;;  %v67_v6 = vld [vmem:[#allocation5] sm:$0xff]  ;;  %v66_v7 = vld [vmem:[#allocation2] sm:$0xff] }
  0x11   :  { %92 = vmatpush.msra.mxu0 %v69_v1  ;;  %v112_v8 = vld [vmem:[#allocation7 + $0x60] sm:$0xff]  ;;  %v111_v9 = vld [vmem:[#allocation7 + $0x58] sm:$0xff]  ;;  %v110_v10 = vld [vmem:[#allocation7 + $0x50] sm:$0xff] }
  0x12   :  { %121 = vmatpush.msra.mxu1 %v114_v4  ;;  %v109_v11 = vld [vmem:[#allocation7 + $0x48] sm:$0xff]  ;;  %v108_v12 = vld [vmem:[#allocation7 + $0x40] sm:$0xff]  ;;  %v107_v13 = vld [vmem:[#allocation7 + $0x38] sm:$0xff] }
  0x13   :  { %93 = vmatpush.msra.mxu0 %v68_v3  ;;  %v106_v14 = vld [vmem:[#allocation7 + $0x30] sm:$0xff]  ;;  %v105_v15 = vld [vmem:[#allocation7 + $0x28] sm:$0xff]  ;;  %v104_v16 = vld [vmem:[#allocation7 + $0x20] sm:$0xff] }
  0x14   :  { %122 = vmatpush.msra.mxu1 %v113_v5  ;;  %v103_v17 = vld [vmem:[#allocation7 + $0x18] sm:$0xff]  ;;  %v102_v18 = vld [vmem:[#allocation7 + $0x10] sm:$0xff]  ;;  %v101_v19 = vld [vmem:[#allocation7 + $0x8] sm:$0xff] }
  0x15   :  { %94 = vmatpush.msra.mxu0 %v67_v6  ;;  %v100_v20 = vld [vmem:[#allocation7] sm:$0xff]  ;;  %v166_v21 = vld [vmem:[%s326_s2] ss:$0 sm:$0xff] }
  0x16   :  { %159 = vmatmul.msk.f32.vlgmr.msra.gmra.mxu0 %vm75_vm0, %v66_v7  ;;  %123 = vmatpush.msra.mxu1 %v112_v8  ;;  %v167_v25 = vld [vmem:[%s328_s4] ss:$0 sm:$0xff] }
  0x18   :  { %124 = vmatpush.msra.mxu1 %v111_v9 }
  0x1a   :  { %125 = vmatpush.msra.mxu1 %v110_v10 }
  0x1c   :  { %126 = vmatpush.msra.mxu1 %v109_v11 }
  0x1e   :  { %127 = vmatpush.msra.mxu1 %v108_v12 }
  0x20   :  { %128 = vmatpush.msra.mxu1 %v107_v13 }
  0x22   :  { %129 = vmatpush.msra.mxu1 %v106_v14 }
  0x24   :  { %130 = vmatpush.msra.mxu1 %v105_v15 }
  0x26   :  { %131 = vmatpush.msra.mxu1 %v104_v16 }
  0x28   :  { %132 = vmatpush.msra.mxu1 %v103_v17 }
  0x2a   :  { %133 = vmatpush.msra.mxu1 %v102_v18 }
  0x2c   :  { %134 = vmatpush.msra.mxu1 %v101_v19 }
  0x2e   :  { %135 = vmatpush.msra.mxu1 %v100_v20 }
  0x93   :  { %v96_v22 = vpop.f32.mrf.mxu0 }
  0x94   :  { %v97_v23 = vadd.f32 %v166_v21, %v96_v22 }
  0x96   :  { %v99_v24 = vmax.f32 %v97_v23, 0.0 }
  0x98   :  { %136 = vmatmul.f32.vlgmr.msra.gmra.mxu1 %v99_v24 }
 0x115   :  { %v137_v26 = vpop.f32.mrf.mxu1 }
 0x116   :  { %v138_v27 = vadd.f32 %v167_v25, %v137_v26 }
 0x118   :  { %140 = vst [vmem:[#allocation8] sm:$0xff] %v138_v27 }
 0x119   :  { %151 = dma.vmem_to_hbm [thread:$0]  %s147_s12, 128, %s149_s15, [#allocation4]  }
 0x11a   :  { %268 = dma.done.wait [#allocation4], 128  }
 0x11b   :  { %269 = vsyncadd [#allocation4], 4294967168 }
 0x11c   :  { %156 = vsyncpa [#allocation3], 1 }
 0x11d   :  { %157 = vsyncpa [#allocation6], 1 }
 0x11e   :  { %158 = vsyncpa [#allocation4], 1 }

</bundles_post_ra>
